<compile_context>
chip_gen: v6e
topology: v6e:2x2x1
jax: 0.10.0
libtpu: 0.0.40
codegen_flags: <defaults>
</compile_context>

<pallas_src>
import functools
import math

import jax
import jax.numpy as jnp
from jax import lax
from jax.experimental import pallas as pl
from jax.experimental.pallas import tpu as pltpu

HIDDEN_DIM = 64
OUTPUT_DIM = 3
IN_DIM = 6

_INV_SQRT2 = 0.7071067811865475
_SQRT_2_OVER_PI = 0.7978845608028654


def _gelu_exact(x):
    # PyTorch nn.GELU() default = exact erf-based GELU (VPU polynomial).
    return 0.5 * x * (1.0 + lax.erf(x * _INV_SQRT2))


def _gelu_tanh(x):
    # tanh approximation: routes the transcendental to the EUP slot.
    return 0.5 * x * (1.0 + jnp.tanh(_SQRT_2_OVER_PI * (x + 0.044715 * x * x * x)))


def _make_kernel(approx_gelu: bool, use_bf16: bool):
    gelu = _gelu_tanh if approx_gelu else _gelu_exact
    op_dtype = jnp.bfloat16 if use_bf16 else jnp.float32

    def mm(w, x):
        # Weights are pre-cast in the wrapper; only the activation needs a
        # cast here.  Accumulate in f32 on the MXU in both paths.
        return jnp.dot(w, x.astype(op_dtype), preferred_element_type=jnp.float32)

    def kernel(x_ref, w1_ref, b123_ref, w23_ref, w4_ref, b4_ref,
               w5_ref, b5_ref, o_ref):
        x = x_ref[...]                                    # (6, TN), op_dtype
        h = gelu(mm(w1_ref[...], x) + b123_ref[0])        # (H, TN) f32
        h = gelu(mm(w23_ref[0], h) + b123_ref[1])         # (H, TN)
        h = gelu(mm(w23_ref[1], h) + b123_ref[2])         # (H, TN)
        h = gelu(mm(w4_ref[...], h) + b4_ref[...])        # (6, TN)
        out = mm(w5_ref[...], h) + b5_ref[...]            # (3, TN)
        o_ref[...] = out.astype(o_ref.dtype)              # lane-dense store

    return kernel


def init_params(key, hidden_dim=HIDDEN_DIM, output_dim=OUTPUT_DIM):
    """Deterministic synthetic parameters (PyTorch-style uniform fan-in init).

    Weights keep torch's (out_features, in_features) layout; biases are stored
    as (out_features, 1) columns so W @ X + b broadcasts over the lane axis.
    """
    layer_dims = [(hidden_dim, IN_DIM), (hidden_dim, hidden_dim),
                  (hidden_dim, hidden_dim), (IN_DIM, hidden_dim),
                  (output_dim, IN_DIM)]
    params = []
    for i, (fan_out, fan_in) in enumerate(layer_dims):
        kw, kb = jax.random.split(jax.random.fold_in(key, i))
        bound = 1.0 / math.sqrt(fan_in)
        w = jax.random.uniform(kw, (fan_out, fan_in), jnp.float32, -bound, bound)
        b = jax.random.uniform(kb, (fan_out, 1), jnp.float32, -bound, bound)
        params.append((w, b))
    return params


def _round_up(x, m):
    return ((x + m - 1) // m) * m


@functools.partial(jax.jit, static_argnames=("tile_n", "approx_gelu", "use_bf16"))
def simple_decoder_forward(w_i, w_o, params, tile_n=8192,
                           approx_gelu=True, use_bf16=True):
    """Pallas implementation of SimpleDecoder.forward(w_i, w_o)."""
    assert w_i.shape == w_o.shape and w_i.shape[-1] == 3
    lead_shape = w_i.shape[:-1]

    op_dtype = jnp.bfloat16 if use_bf16 else jnp.float32

    # One lane-dense (6, N) input: z = concat([w_i, w_o], -1), transposed once.
    z = jnp.concatenate([w_i, w_o], axis=-1).astype(jnp.float32)
    x = z.reshape(-1, IN_DIM).T.astype(op_dtype)           # (6, N)
    n = x.shape[1]

    # Lane tile: multiple of 128, large to amortize per-grid-step overhead,
    # but capped at ~N/2 so the 1-D "parallel" grid keeps >= 2 steps (keeps
    # both v7x TensorCores busy); clamped to 128 for tiny inputs.
    if n <= 128:
        tn = 128
    else:
        max_useful = _round_up((n + 1) // 2, 128)
        tn = max(128, min(_round_up(tile_n, 128), max_useful))
    n_pad = _round_up(n, tn)
    if n_pad != n:
        x = jnp.pad(x, ((0, 0), (0, n_pad - n)))

    (w1, b1), (w2, b2), (w3, b3), (w4, b4), (w5, b5) = params
    hd = w1.shape[0]
    od = w5.shape[0]

    # Cast weights once here (not inside the kernel per grid step); pack the
    # hidden-layer weights/biases to shrink the operand count.  Biases stay f32.
    w1c = w1.astype(op_dtype)                              # (H, 6)
    w23 = jnp.stack([w2, w3], axis=0).astype(op_dtype)     # (2, H, H)
    b123 = jnp.stack([b1, b2, b3], axis=0)                 # (3, H, 1) f32
    w4c = w4.astype(op_dtype)                              # (6, H)
    w5c = w5.astype(op_dtype)                              # (3, 6)

    lane = lambda i: (0, i)                                # tile the lane axis
    rep2 = lambda i: (0, 0)                                # resident 2-D block
    rep3 = lambda i: (0, 0, 0)                             # resident 3-D block

    out = pl.pallas_call(
        _make_kernel(approx_gelu, use_bf16),
        out_shape=jax.ShapeDtypeStruct((od, n_pad), jnp.float32),
        grid_spec=pltpu.PrefetchScalarGridSpec(
            num_scalar_prefetch=0,
            grid=(n_pad // tn,),
            in_specs=[
                pl.BlockSpec((IN_DIM, tn), lane),          # z^T
                pl.BlockSpec((hd, IN_DIM), rep2),          # w1
                pl.BlockSpec((3, hd, 1), rep3),            # b1 | b2 | b3
                pl.BlockSpec((2, hd, hd), rep3),           # w2 | w3
                pl.BlockSpec((IN_DIM, hd), rep2),          # w4
                pl.BlockSpec((IN_DIM, 1), rep2),           # b4
                pl.BlockSpec((od, IN_DIM), rep2),          # w5
                pl.BlockSpec((od, 1), rep2),               # b5
            ],
            out_specs=pl.BlockSpec((od, tn), lane),
        ),
        compiler_params=pltpu.CompilerParams(
            dimension_semantics=("parallel",),
            vmem_limit_bytes=32 * 1024 * 1024,
        ),
    )(x, w1c, b123, w23, w4c, b4, w5c, b5)

    out = out[:, :n].T                                      # (N, 3)
    return out.reshape(*lead_shape, od)


def _reference_forward(w_i, w_o, params):
    z = jnp.concatenate([w_i, w_o], axis=-1).astype(jnp.float32)
    g = lambda v: 0.5 * v * (1.0 + lax.erf(v * _INV_SQRT2))
    (w1, b1), (w2, b2), (w3, b3), (w4, b4), (w5, b5) = params
    z = g(z @ w1.T + b1[:, 0])
    z = g(z @ w2.T + b2[:, 0])
    z = g(z @ w3.T + b3[:, 0])
    z = g(z @ w4.T + b4[:, 0])
    return z @ w5.T + b5[:, 0]


if __name__ == "__main__":
    key = jax.random.PRNGKey(0)
    k_p, k_i, k_o = jax.random.split(key, 3)

    params = init_params(k_p)

    # small deterministic inputs: batch of 2 x 8 direction vectors, 3 components
    w_i = jax.random.normal(k_i, (2, 8, 3), jnp.float32)
    w_o = jax.random.normal(k_o, (2, 8, 3), jnp.float32)

    ref = _reference_forward(w_i, w_o, params)

    # Exact-parity path: f32 MXU + erf GELU matches the PyTorch module to 1e-5.
    out_exact = simple_decoder_forward(w_i, w_o, params,
                                       approx_gelu=False, use_bf16=False)
    out_exact = jax.block_until_ready(out_exact)
    assert out_exact.shape == (2, 8, 3), out_exact.shape
    assert jnp.allclose(out_exact, ref, atol=1e-5, rtol=1e-5), \
        float(jnp.max(jnp.abs(out_exact - ref)))

    # Default fast path: bf16 MXU operands (f32 accumulation) + tanh GELU.
    # Parity with the f32/erf reference is intentionally looser here.
    out_fast = simple_decoder_forward(w_i, w_o, params)
    out_fast = jax.block_until_ready(out_fast)
    assert out_fast.shape == (2, 8, 3), out_fast.shape
    assert jnp.allclose(out_fast, ref, atol=1e-1, rtol=1e-1), \
        float(jnp.max(jnp.abs(out_fast - ref)))

    print("KERNEL_OK")
</pallas_src>

<mosaic_0001>
module attributes {stable_mosaic.version = 11 : i64} {
  func.func @kernel(%arg0: i32, %arg1: memref<6x128xf32, #tpu.memory_space<vmem>>, %arg2: memref<64x6xf32, #tpu.memory_space<vmem>>, %arg3: memref<3x64x1xf32, #tpu.memory_space<vmem>>, %arg4: memref<2x64x64xf32, #tpu.memory_space<vmem>>, %arg5: memref<6x64xf32, #tpu.memory_space<vmem>>, %arg6: memref<6x1xf32, #tpu.memory_space<vmem>>, %arg7: memref<3x6xf32, #tpu.memory_space<vmem>>, %arg8: memref<3x1xf32, #tpu.memory_space<vmem>>, %arg9: memref<3x128xf32, #tpu.memory_space<vmem>>) attributes {dimension_semantics = [#tpu.dimension_semantics<parallel>], iteration_bounds = array<i64: 1>, scalar_prefetch = 0 : i64, scratch_operands = 0 : i64, tpu.core_type = #tpu.core_type<tc>, window_params = [{transform_indices = @transform_0, window_bounds = array<i64: 6, 128>}, {pipeline_mode = #tpu.pipeline_mode<synchronous>, transform_indices = @transform_1, window_bounds = array<i64: 64, 6>}, {pipeline_mode = #tpu.pipeline_mode<synchronous>, transform_indices = @transform_2, window_bounds = array<i64: 3, 64, 1>}, {pipeline_mode = #tpu.pipeline_mode<synchronous>, transform_indices = @transform_3, window_bounds = array<i64: 2, 64, 64>}, {pipeline_mode = #tpu.pipeline_mode<synchronous>, transform_indices = @transform_4, window_bounds = array<i64: 6, 64>}, {pipeline_mode = #tpu.pipeline_mode<synchronous>, transform_indices = @transform_5, window_bounds = array<i64: 6, 1>}, {pipeline_mode = #tpu.pipeline_mode<synchronous>, transform_indices = @transform_6, window_bounds = array<i64: 3, 6>}, {pipeline_mode = #tpu.pipeline_mode<synchronous>, transform_indices = @transform_7, window_bounds = array<i64: 3, 1>}, {transform_indices = @transform_8, window_bounds = array<i64: 3, 128>}]} {
    %c0 = arith.constant 0 : index
    %c0_0 = arith.constant 0 : index
    %0 = vector.load %arg1[%c0, %c0_0] : memref<6x128xf32, #tpu.memory_space<vmem>>, vector<6x128xf32>
    %c0_1 = arith.constant 0 : index
    %c0_2 = arith.constant 0 : index
    %1 = vector.load %arg2[%c0_1, %c0_2] : memref<64x6xf32, #tpu.memory_space<vmem>>, vector<64x6xf32>
    %cst = arith.constant dense<0.000000e+00> : vector<64x128xf32>
    %2 = tpu.matmul %1, %0, %cst {dimension_numbers = #tpu.dot_dimension_numbers<[1], [0], [0], [1], [0, 0, 1, 1], [], []>} : vector<64x6xf32>, vector<6x128xf32>, vector<64x128xf32> -> vector<64x128xf32>
    %c0_3 = arith.constant 0 : index
    %c0_4 = arith.constant 0 : index
    %c0_5 = arith.constant 0 : index
    %3 = vector.load %arg3[%c0_3, %c0_4, %c0_5] : memref<3x64x1xf32, #tpu.memory_space<vmem>>, vector<1x64x1xf32>
    %4 = vector.shape_cast %3 : vector<1x64x1xf32> to vector<64x1xf32>
    %5 = vector.broadcast %4 : vector<64x1xf32> to vector<64x128xf32>
    %6 = arith.addf %2, %5 : vector<64x128xf32>
    %cst_6 = arith.constant 5.000000e-01 : f32
    %7 = vector.broadcast %cst_6 : f32 to vector<64x128xf32>
    %8 = arith.mulf %7, %6 : vector<64x128xf32>
    %cst_7 = arith.constant 0.707106769 : f32
    %9 = vector.broadcast %cst_7 : f32 to vector<64x128xf32>
    %10 = arith.mulf %6, %9 : vector<64x128xf32>
    %11 = math.erf %10 : vector<64x128xf32>
    %cst_8 = arith.constant 1.000000e+00 : f32
    %12 = vector.broadcast %cst_8 : f32 to vector<64x128xf32>
    %13 = arith.addf %12, %11 : vector<64x128xf32>
    %14 = arith.mulf %8, %13 : vector<64x128xf32>
    %c0_9 = arith.constant 0 : index
    %c0_10 = arith.constant 0 : index
    %c0_11 = arith.constant 0 : index
    %15 = vector.load %arg4[%c0_9, %c0_10, %c0_11] : memref<2x64x64xf32, #tpu.memory_space<vmem>>, vector<1x64x64xf32>
    %16 = vector.shape_cast %15 : vector<1x64x64xf32> to vector<64x64xf32>
    %cst_12 = arith.constant dense<0.000000e+00> : vector<64x128xf32>
    %17 = tpu.matmul %16, %14, %cst_12 {dimension_numbers = #tpu.dot_dimension_numbers<[1], [0], [0], [1], [0, 0, 1, 1], [], []>} : vector<64x64xf32>, vector<64x128xf32>, vector<64x128xf32> -> vector<64x128xf32>
    %c1 = arith.constant 1 : index
    %c0_13 = arith.constant 0 : index
    %c0_14 = arith.constant 0 : index
    %18 = vector.load %arg3[%c1, %c0_13, %c0_14] : memref<3x64x1xf32, #tpu.memory_space<vmem>>, vector<1x64x1xf32>
    %19 = vector.shape_cast %18 : vector<1x64x1xf32> to vector<64x1xf32>
    %20 = vector.broadcast %19 : vector<64x1xf32> to vector<64x128xf32>
    %21 = arith.addf %17, %20 : vector<64x128xf32>
    %cst_15 = arith.constant 5.000000e-01 : f32
    %22 = vector.broadcast %cst_15 : f32 to vector<64x128xf32>
    %23 = arith.mulf %22, %21 : vector<64x128xf32>
    %cst_16 = arith.constant 0.707106769 : f32
    %24 = vector.broadcast %cst_16 : f32 to vector<64x128xf32>
    %25 = arith.mulf %21, %24 : vector<64x128xf32>
    %26 = math.erf %25 : vector<64x128xf32>
    %cst_17 = arith.constant 1.000000e+00 : f32
    %27 = vector.broadcast %cst_17 : f32 to vector<64x128xf32>
    %28 = arith.addf %27, %26 : vector<64x128xf32>
    %29 = arith.mulf %23, %28 : vector<64x128xf32>
    %c1_18 = arith.constant 1 : index
    %c0_19 = arith.constant 0 : index
    %c0_20 = arith.constant 0 : index
    %30 = vector.load %arg4[%c1_18, %c0_19, %c0_20] : memref<2x64x64xf32, #tpu.memory_space<vmem>>, vector<1x64x64xf32>
    %31 = vector.shape_cast %30 : vector<1x64x64xf32> to vector<64x64xf32>
    %cst_21 = arith.constant dense<0.000000e+00> : vector<64x128xf32>
    %32 = tpu.matmul %31, %29, %cst_21 {dimension_numbers = #tpu.dot_dimension_numbers<[1], [0], [0], [1], [0, 0, 1, 1], [], []>} : vector<64x64xf32>, vector<64x128xf32>, vector<64x128xf32> -> vector<64x128xf32>
    %c2 = arith.constant 2 : index
    %c0_22 = arith.constant 0 : index
    %c0_23 = arith.constant 0 : index
    %33 = vector.load %arg3[%c2, %c0_22, %c0_23] : memref<3x64x1xf32, #tpu.memory_space<vmem>>, vector<1x64x1xf32>
    %34 = vector.shape_cast %33 : vector<1x64x1xf32> to vector<64x1xf32>
    %35 = vector.broadcast %34 : vector<64x1xf32> to vector<64x128xf32>
    %36 = arith.addf %32, %35 : vector<64x128xf32>
    %cst_24 = arith.constant 5.000000e-01 : f32
    %37 = vector.broadcast %cst_24 : f32 to vector<64x128xf32>
    %38 = arith.mulf %37, %36 : vector<64x128xf32>
    %cst_25 = arith.constant 0.707106769 : f32
    %39 = vector.broadcast %cst_25 : f32 to vector<64x128xf32>
    %40 = arith.mulf %36, %39 : vector<64x128xf32>
    %41 = math.erf %40 : vector<64x128xf32>
    %cst_26 = arith.constant 1.000000e+00 : f32
    %42 = vector.broadcast %cst_26 : f32 to vector<64x128xf32>
    %43 = arith.addf %42, %41 : vector<64x128xf32>
    %44 = arith.mulf %38, %43 : vector<64x128xf32>
    %c0_27 = arith.constant 0 : index
    %c0_28 = arith.constant 0 : index
    %45 = vector.load %arg5[%c0_27, %c0_28] : memref<6x64xf32, #tpu.memory_space<vmem>>, vector<6x64xf32>
    %cst_29 = arith.constant dense<0.000000e+00> : vector<6x128xf32>
    %46 = tpu.matmul %45, %44, %cst_29 {dimension_numbers = #tpu.dot_dimension_numbers<[1], [0], [0], [1], [0, 0, 1, 1], [], []>} : vector<6x64xf32>, vector<64x128xf32>, vector<6x128xf32> -> vector<6x128xf32>
    %c0_30 = arith.constant 0 : index
    %c0_31 = arith.constant 0 : index
    %47 = vector.load %arg6[%c0_30, %c0_31] : memref<6x1xf32, #tpu.memory_space<vmem>>, vector<6x1xf32>
    %48 = vector.broadcast %47 : vector<6x1xf32> to vector<6x128xf32>
    %49 = arith.addf %46, %48 : vector<6x128xf32>
    %cst_32 = arith.constant 5.000000e-01 : f32
    %50 = vector.broadcast %cst_32 : f32 to vector<6x128xf32>
    %51 = arith.mulf %50, %49 : vector<6x128xf32>
    %cst_33 = arith.constant 0.707106769 : f32
    %52 = vector.broadcast %cst_33 : f32 to vector<6x128xf32>
    %53 = arith.mulf %49, %52 : vector<6x128xf32>
    %54 = math.erf %53 : vector<6x128xf32>
    %cst_34 = arith.constant 1.000000e+00 : f32
    %55 = vector.broadcast %cst_34 : f32 to vector<6x128xf32>
    %56 = arith.addf %55, %54 : vector<6x128xf32>
    %57 = arith.mulf %51, %56 : vector<6x128xf32>
    %c0_35 = arith.constant 0 : index
    %c0_36 = arith.constant 0 : index
    %58 = vector.load %arg7[%c0_35, %c0_36] : memref<3x6xf32, #tpu.memory_space<vmem>>, vector<3x6xf32>
    %cst_37 = arith.constant dense<0.000000e+00> : vector<3x128xf32>
    %59 = tpu.matmul %58, %57, %cst_37 {dimension_numbers = #tpu.dot_dimension_numbers<[1], [0], [0], [1], [0, 0, 1, 1], [], []>} : vector<3x6xf32>, vector<6x128xf32>, vector<3x128xf32> -> vector<3x128xf32>
    %c0_38 = arith.constant 0 : index
    %c0_39 = arith.constant 0 : index
    %60 = vector.load %arg8[%c0_38, %c0_39] : memref<3x1xf32, #tpu.memory_space<vmem>>, vector<3x1xf32>
    %61 = vector.broadcast %60 : vector<3x1xf32> to vector<3x128xf32>
    %62 = arith.addf %59, %61 : vector<3x128xf32>
    %c0_40 = arith.constant 0 : index
    %c0_41 = arith.constant 0 : index
    %63 = vector.load %arg9[%c0_40, %c0_41] : memref<3x128xf32, #tpu.memory_space<vmem>>, vector<3x128xf32>
    tpu.vector_store %arg9[%c0_40, %c0_41], %62 {strides = array<i32>} : memref<3x128xf32, #tpu.memory_space<vmem>>, vector<3x128xf32>,
    return
  }
  func.func @transform_0(%arg0: i32) -> (i32, i32) {
    %c0_i32 = arith.constant 0 : i32
    %c0_i32_0 = arith.constant 0 : i32
    return %c0_i32, %arg0 : i32, i32
  }
  func.func @transform_1(%arg0: i32) -> (i32, i32) {
    %c0_i32 = arith.constant 0 : i32
    %c0_i32_0 = arith.constant 0 : i32
    %c0_i32_1 = arith.constant 0 : i32
    return %c0_i32, %c0_i32_0 : i32, i32
  }
  func.func @transform_2(%arg0: i32) -> (i32, i32, i32) {
    %c0_i32 = arith.constant 0 : i32
    %c0_i32_0 = arith.constant 0 : i32
    %c0_i32_1 = arith.constant 0 : i32
    %c0_i32_2 = arith.constant 0 : i32
    return %c0_i32, %c0_i32_0, %c0_i32_1 : i32, i32, i32
  }
  func.func @transform_3(%arg0: i32) -> (i32, i32, i32) {
    %c0_i32 = arith.constant 0 : i32
    %c0_i32_0 = arith.constant 0 : i32
    %c0_i32_1 = arith.constant 0 : i32
    %c0_i32_2 = arith.constant 0 : i32
    return %c0_i32, %c0_i32_0, %c0_i32_1 : i32, i32, i32
  }
  func.func @transform_4(%arg0: i32) -> (i32, i32) {
    %c0_i32 = arith.constant 0 : i32
    %c0_i32_0 = arith.constant 0 : i32
    %c0_i32_1 = arith.constant 0 : i32
    return %c0_i32, %c0_i32_0 : i32, i32
  }
  func.func @transform_5(%arg0: i32) -> (i32, i32) {
    %c0_i32 = arith.constant 0 : i32
    %c0_i32_0 = arith.constant 0 : i32
    %c0_i32_1 = arith.constant 0 : i32
    return %c0_i32, %c0_i32_0 : i32, i32
  }
  func.func @transform_6(%arg0: i32) -> (i32, i32) {
    %c0_i32 = arith.constant 0 : i32
    %c0_i32_0 = arith.constant 0 : i32
    %c0_i32_1 = arith.constant 0 : i32
    return %c0_i32, %c0_i32_0 : i32, i32
  }
  func.func @transform_7(%arg0: i32) -> (i32, i32) {
    %c0_i32 = arith.constant 0 : i32
    %c0_i32_0 = arith.constant 0 : i32
    %c0_i32_1 = arith.constant 0 : i32
    return %c0_i32, %c0_i32_0 : i32, i32
  }
  func.func @transform_8(%arg0: i32) -> (i32, i32) {
    %c0_i32 = arith.constant 0 : i32
    %c0_i32_0 = arith.constant 0 : i32
    return %c0_i32, %arg0 : i32, i32
  }
}

</mosaic_0001>

<bundles_post_ra>
// kernel: simple_decoder_forward.1
= control target key start
LH: loop header
LB: loop body
LE: loop exit
PB: predicated region body
PF: predicated region fallthrough
CT: control target
= control target key end

     0   :  { %vm111_vm0 = vcmask 1045504   ;;  %vm86_vm1 = vcmask 48128   ;;  %v1140_v3 = vmov 0   ;;  %vm317_vm2 = vcmask 523264   ;;  %s1390_s0 = inlined_call_operand.vmem [shape: f32[6,128], index: 0, kind: input, shape index: {}]   ;;  %s1391_s1 = inlined_call_operand.vmem [shape: f32[64,6], index: 1, kind: input, shape index: {}]   ;;  %s1392_s2 = inlined_call_operand.vmem [shape: f32[3,64,1], index: 2, kind: input, shape index: {}]   ;;  %s1393_s5 = inlined_call_operand.vmem [shape: f32[6,1], index: 5, kind: input, shape index: {}]   ;;  %s1394_s7 = inlined_call_operand.vmem [shape: f32[3,1], index: 7, kind: input, shape index: {}]   ;;  %s1395_s3 = inlined_call_operand.vmem [shape: f32[2,64,64], index: 3, kind: input, shape index: {}]   ;;  %s1396_s4 = inlined_call_operand.vmem [shape: f32[6,64], index: 4, kind: input, shape index: {}]   ;;  %s1397_s6 = inlined_call_operand.vmem [shape: f32[3,6], index: 6, kind: input, shape index: {}]   ;;  %s1398_s8 = inlined_call_operand.vmem [shape: f32[3,128], index: 8, kind: output, shape index: {}]  }
   0x1   :  { %v29_v0 = vld [vmem:[%s1390_s0] sm:$0x3f]  ;;  %v31_v2 = vld [vmem:[%s1391_s1 + $0x8] sm:$0xff]  ;;  %1088 = vset.pattern.permute.xlu0 %v1140_v3  ;;  %1089 = vset.pattern.permute.xlu1 %v1140_v3  ;;  %v32_v4 = vld [vmem:[%s1391_s1 + $0x10] sm:$0xff]  ;;  %vm1142_vm3 = vmmov 0  }
   0x2   :  { %v30_v1 = vld [vmem:[%s1391_s1] sm:$0xff]  ;;  %991 = vmatprep.subr.msk.mxu0 %vm111_vm0, %v29_v0  ;;  %v45_v5 = vld [vmem:[%s1392_s2 + $0x38] sm:$0xff]  ;;  %v43_v6 = vld [vmem:[%s1392_s2 + $0x28] sm:$0xff] }
   0x3   :  { %993 = vmatprep.mubr.msk.f32.mxu0 %vm86_vm1, %v30_v1  ;;  %992 = vmatpush3.msk.msra.mxu0 %vm111_vm0, %v29_v0  ;;  %v33_v7 = vld [vmem:[%s1391_s1 + $0x18] sm:$0xff]  ;;  %v34_v8 = vld [vmem:[%s1391_s1 + $0x20] sm:$0xff]  ;;  %v44_v9 = vld [vmem:[%s1392_s2 + $0x30] sm:$0xff] }
   0x4   :  { %994 = vmatmul.mubr.msk.f32.vlgmr.msra.gmra.mxu0 %vm86_vm1, %v31_v2  ;;  %83 = vperm.xlu0 %1088, %v45_v5   ;;  %v42_v10 = vld [vmem:[%s1392_s2 + $0x20] sm:$0xff]  ;;  %v35_v11 = vld [vmem:[%s1391_s1 + $0x28] sm:$0xff]  ;;  %v36_v12 = vld [vmem:[%s1391_s1 + $0x30] sm:$0xff] }
   0x5   :  { %996 = vmatprep.mubr.msk.f32.mxu0 %vm86_vm1, %v32_v4  ;;  %73 = vperm.xlu1 %1089, %v43_v6   ;;  %v41_v13 = vld [vmem:[%s1392_s2 + $0x18] sm:$0xff]  ;;  %v40_v14 = vld [vmem:[%s1392_s2 + $0x10] sm:$0xff]  ;;  %v39_v16 = vld [vmem:[%s1392_s2 + $0x8] sm:$0xff] }
   0x6   :  { %v37_v15 = vld [vmem:[%s1391_s1 + $0x38] sm:$0xff]  ;;  %v38_v17 = vld [vmem:[%s1392_s2] sm:$0xff]  ;;  %v902_v19 = vld [vmem:[%s1392_s2 + $0x70] sm:$0xff] }
   0x7   :  { %v903_v18 = vld [vmem:[%s1392_s2 + $0x78] sm:$0xff]  ;;  %v901_v20 = vld [vmem:[%s1392_s2 + $0x68] sm:$0xff]  ;;  %v900_v21 = vld [vmem:[%s1392_s2 + $0x60] sm:$0xff] }
   0x8   :  { %997 = vmatmul.mubr.msk.f32.gmra.mxu0 %vm86_vm1, %v33_v7  ;;  %78 = vperm.xlu0 %1088, %v44_v9   ;;  %v899_v22 = vld [vmem:[%s1392_s2 + $0x58] sm:$0xff]  ;;  %v898_v23 = vld [vmem:[%s1392_s2 + $0x50] sm:$0xff]  ;;  %v897_v24 = vld [vmem:[%s1392_s2 + $0x48] sm:$0xff] }
   0x9   :  { %999 = vmatprep.mubr.msk.f32.mxu0 %vm86_vm1, %v34_v8  ;;  %68 = vperm.xlu1 %1089, %v42_v10   ;;  %v896_v25 = vld [vmem:[%s1392_s2 + $0x40] sm:$0xff]  ;;  %v927_v26 = vld [vmem:[%s1392_s2 + $0xb8] sm:$0xff]  ;;  %v926_v27 = vld [vmem:[%s1392_s2 + $0xb0] sm:$0xff] }
   0xa   :  { %v925_v28 = vld [vmem:[%s1392_s2 + $0xa8] sm:$0xff]  ;;  %v924_v29 = vld [vmem:[%s1392_s2 + $0xa0] sm:$0xff]  ;;  %v923_v30 = vld [vmem:[%s1392_s2 + $0x98] sm:$0xff] }
   0xb   :  { %v922_v31 = vld [vmem:[%s1392_s2 + $0x90] sm:$0xff]  ;;  %v921_v32 = vld [vmem:[%s1392_s2 + $0x88] sm:$0xff]  ;;  %v920_v33 = vld [vmem:[%s1392_s2 + $0x80] sm:$0xff] }
   0xc   :  { %1000 = vmatmul.mubr.msk.f32.gmra.mxu0 %vm86_vm1, %v35_v11  ;;  %63 = vperm.xlu0 %1088, %v41_v13   ;;  %v715_v34 = vld [vmem:[%s1393_s5] sm:$0x3f] }
   0xd   :  { %1002 = vmatprep.mubr.msk.f32.mxu0 %vm86_vm1, %v36_v12  ;;  %58 = vperm.xlu1 %1089, %v40_v14   ;;  %v800_v35 = vld [vmem:[%s1394_s7] sm:$0x7] }
   0xe   :  { %v260_v36 = vld [vmem:[%s1395_s3] sm:$0xff] }
   0xf   :  { %1021 = vmatprep.mubr.msk.f32.mxu1 %vm317_vm2, %v260_v36 }
  0x10   :  { %1003 = vmatmul.mubr.msk.f32.gmra.mxu0 %vm86_vm1, %v37_v15  ;;  %53 = vperm.xlu0 %1088, %v39_v16  }
  0x11   :  { %48 = vperm.xlu1 %1089, %v38_v17  }
  0x14   :  { %314 = vperm.xlu0 %1088, %v903_v18  }
  0x15   :  { %309 = vperm.xlu1 %1089, %v902_v19  }
  0x18   :  { %304 = vperm.xlu0 %1088, %v901_v20  }
  0x19   :  { %299 = vperm.xlu1 %1089, %v900_v21  }
  0x1c   :  { %294 = vperm.xlu0 %1088, %v899_v22  }
  0x1d   :  { %289 = vperm.xlu1 %1089, %v898_v23  }
  0x20   :  { %284 = vperm.xlu0 %1088, %v897_v24  }
  0x21   :  { %279 = vperm.xlu1 %1089, %v896_v25  }
  0x24   :  { %542 = vperm.xlu0 %1088, %v927_v26  }
  0x25   :  { %537 = vperm.xlu1 %1089, %v926_v27  }
  0x28   :  { %532 = vperm.xlu0 %1088, %v925_v28  }
  0x29   :  { %527 = vperm.xlu1 %1089, %v924_v29  }
  0x2c   :  { %522 = vperm.xlu0 %1088, %v923_v30  }
  0x2d   :  { %517 = vperm.xlu1 %1089, %v922_v31  }
  0x30   :  { %512 = vperm.xlu0 %1088, %v921_v32  }
  0x31   :  { %507 = vperm.xlu1 %1089, %v920_v33  }
  0x34   :  { %718 = vperm.xlu0 %1088, %v715_v34  }
  0x35   :  { %803 = vperm.xlu1 %1089, %v800_v35  }
  0x7f   :  { %v84_v37 = vpop.permute.xlu0 %83 }
  0x80   :  { %v74_v38 = vpop.permute.xlu1 %73 }
  0x83   :  { %v79_v41 = vpop.permute.xlu0 %78 }
  0x84   :  { %v69_v43 = vpop.permute.xlu1 %68 }
  0x87   :  { %v64_v47 = vpop.permute.xlu0 %63 }
  0x88   :  { %v59_v50 = vpop.permute.xlu1 %58 }
  0x8b   :  { %v54_v60 = vpop.permute.xlu0 %53 }
  0x8c   :  { %v49_v0 = vpop.permute.xlu1 %48 }
  0xc4   :  { %v995_v39 = vpop.f32.mrf.mxu0 }
  0xc5   :  { %v187_v61 = vadd.f32 %v995_v39, %v54_v60  ;;  %v263_v39 = vld [vmem:[%s1395_s3 + $0x18] sm:$0xff] }
  0xc6   :  { %v181_v40 = vpop.f32.mrf.mxu0 }
  0xc7   :  { %v182_v1 = vadd.f32 %v181_v40, %v49_v0  ;;  %v229_v3 = vmul.f32 0.70710677, %v187_v61  ;;  %v221_v31 = vmul.f32 0.5, %v187_v61  ;;  %v264_v40 = vld [vmem:[%s1395_s3 + $0x20] sm:$0xff] }
  0xc8   :  { %v998_v42 = vpop.f32.mrf.mxu0 }
  0xc9   :  { %v197_v53 = vadd.f32 %v998_v42, %v64_v47  ;;  %v228_v4 = vmul.f32 0.70710677, %v182_v1  ;;  %v220_v34 = vmul.f32 0.5, %v182_v1  ;;  %v266_v42 = vld [vmem:[%s1395_s3 + $0x30] sm:$0xff] }
  0xca   :  { %v191_v44 = vpop.f32.mrf.mxu0 }
  0xcb   :  { %v192_v57 = vadd.f32 %v191_v44, %v59_v50  ;;  %v231_v62 = vmul.f32 0.70710677, %v197_v53  ;;  %v223_v24 = vmul.f32 0.5, %v197_v53  ;;  %v912_v44 = vld [vmem:[%s1395_s3 + $0x40] sm:$0xff] }
  0xcc   :  { %v1001_v45 = vpop.f32.mrf.mxu0  ;;  %1049 = vmatprep.mubr.msk.f32.mxu0 %vm317_vm2, %v912_v44 }
  0xcd   :  { %v207_v46 = vadd.f32 %v1001_v45, %v74_v38  ;;  %v230_v2 = vmul.f32 0.70710677, %v192_v57  ;;  %v222_v28 = vmul.f32 0.5, %v192_v57  ;;  %v262_v38 = vld [vmem:[%s1395_s3 + $0x10] sm:$0xff]  ;;  %v315_v45 = vpop.permute.xlu0 %314 }
  0xce   :  { %v201_v48 = vpop.f32.mrf.mxu0 }
  0xcf   :  { %v202_v49 = vadd.f32 %v201_v48, %v69_v43  ;;  %v233_v51 = vmul.f32 0.70710677, %v207_v46  ;;  %v225_v16 = vmul.f32 0.5, %v207_v46  ;;  %v267_v43 = vld [vmem:[%s1395_s3 + $0x38] sm:$0xff]  ;;  %v310_v46 = vpop.permute.xlu1 %309 }
  0xd0   :  { %v1004_v52 = vpop.f32.mrf.mxu0 }
  0xd1   :  { %v217_v54 = vadd.f32 %v1004_v52, %v84_v37  ;;  %v232_v55 = vmul.f32 0.70710677, %v202_v49  ;;  %1090 = verf.f32 %v233_v51  ;;  %v224_v20 = vmul.f32 0.5, %v202_v49  ;;  %v261_v37 = vld [vmem:[%s1395_s3 + $0x8] sm:$0xff]  ;;  %v305_v49 = vpop.permute.xlu0 %304 }
  0xd2   :  { %v211_v56 = vpop.f32.mrf.mxu0 }
  0xd3   :  { %v235_v58 = vmul.f32 0.70710677, %v217_v54  ;;  %v212_v59 = vadd.f32 %v211_v56, %v79_v41  ;;  %v227_v8 = vmul.f32 0.5, %v217_v54  ;;  %v265_v41 = vld [vmem:[%s1395_s3 + $0x28] sm:$0xff]  ;;  %v300_v51 = vpop.permute.xlu1 %299 }
  0xd5   :  { %1092 = verf.f32 %v235_v58  ;;  %v234_v63 = vmul.f32 0.70710677, %v212_v59  ;;  %v226_v11 = vmul.f32 0.5, %v212_v59 }
  0xd6   :  { %1094 = verf.f32 %v232_v55  ;;  %v295_v55 = vpop.permute.xlu0 %294 }
  0xd7   :  { %1096 = verf.f32 %v234_v63  ;;  %v290_v58 = vpop.permute.xlu1 %289 }
  0xd8   :  { %1098 = verf.f32 %v231_v62 }
  0xd9   :  { %1100 = verf.f32 %v230_v2 }
  0xda   :  { %1102 = verf.f32 %v229_v3 }
  0xdb   :  { %1104 = verf.f32 %v228_v4  ;;  %v285_v4 = vpop.permute.xlu0 %284 }
  0xde   :  { %v1091_v5 = vpop.eup %1090 }
  0xdf   :  { %v249_v14 = vadd.f32 1.0, %v1091_v5 }
  0xe1   :  { %v257_v21 = vmul.f32 %v249_v14, %v225_v16 }
  0xe2   :  { %v1093_v6 = vpop.eup %1092 }
  0xe3   :  { %v1095_v7 = vpop.eup %1094  ;;  %v251_v9 = vadd.f32 1.0, %v1093_v6 }
  0xe4   :  { %v1097_v10 = vpop.eup %1096  ;;  %v248_v18 = vadd.f32 1.0, %v1095_v7 }
  0xe5   :  { %v259_v12 = vmul.f32 %v251_v9, %v227_v8  ;;  %v250_v13 = vadd.f32 1.0, %v1097_v10  ;;  %v1099_v15 = vpop.eup %1098  ;;  %v280_v8 = vpop.permute.xlu1 %279 }
  0xe6   :  { %v1101_v19 = vpop.eup %1100  ;;  %v247_v22 = vadd.f32 1.0, %v1099_v15  ;;  %v256_v25 = vmul.f32 %v248_v18, %v224_v20 }
  0xe7   :  { %1005 = vmatprep.subr.mxu1 %v259_v12  ;;  %v258_v17 = vmul.f32 %v250_v13, %v226_v11  ;;  %v1103_v23 = vpop.eup %1102  ;;  %v246_v26 = vadd.f32 1.0, %v1101_v19 }
  0xe8   :  { %1006 = vmatpush3.msra.mxu1 %v259_v12  ;;  %v1105_v27 = vpop.eup %1104  ;;  %v255_v29 = vmul.f32 %v247_v22, %v223_v24  ;;  %v245_v30 = vadd.f32 1.0, %v1103_v23 }
  0xe9   :  { %1007 = vmatprep.subr.mxu1 %v258_v17  ;;  %v254_v32 = vmul.f32 %v246_v26, %v222_v28  ;;  %v244_v33 = vadd.f32 1.0, %v1105_v27 }
  0xea   :  { %1008 = vmatpush3.msra.mxu1 %v258_v17  ;;  %v253_v35 = vmul.f32 %v245_v30, %v221_v31 }
  0xeb   :  { %1009 = vmatprep.subr.mxu1 %v257_v21  ;;  %v252_v36 = vmul.f32 %v244_v33, %v220_v34 }
  0xec   :  { %1010 = vmatpush3.msra.mxu1 %v257_v21 }
  0xed   :  { %1011 = vmatprep.subr.mxu1 %v256_v25 }
  0xee   :  { %1012 = vmatpush3.msra.mxu1 %v256_v25 }
  0xef   :  { %1013 = vmatprep.subr.mxu1 %v255_v29 }
  0xf0   :  { %1014 = vmatpush3.msra.mxu1 %v255_v29 }
  0xf1   :  { %1015 = vmatprep.subr.mxu1 %v254_v32 }
  0xf2   :  { %1016 = vmatpush3.msra.mxu1 %v254_v32 }
  0xf3   :  { %1017 = vmatprep.subr.mxu1 %v253_v35 }
  0xf4   :  { %1018 = vmatpush3.msra.mxu1 %v253_v35 }
  0xf5   :  { %1019 = vmatprep.subr.mxu1 %v252_v36 }
  0xf6   :  { %1020 = vmatpush3.msra.mxu1 %v252_v36 }
  0xf7   :  { %1022 = vmatmul.mubr.msk.f32.vlgmr.msra.gmra.mxu1 %vm317_vm2, %v261_v37 }
  0xf8   :  { %1024 = vmatprep.mubr.msk.f32.mxu1 %vm317_vm2, %v262_v38 }
  0xfb   :  { %1025 = vmatmul.mubr.msk.f32.gmra.mxu1 %vm317_vm2, %v263_v39 }
  0xfc   :  { %1027 = vmatprep.mubr.msk.f32.mxu1 %vm317_vm2, %v264_v40 }
  0xff   :  { %1028 = vmatmul.mubr.msk.f32.gmra.mxu1 %vm317_vm2, %v265_v41 }
 0x100   :  { %1030 = vmatprep.mubr.msk.f32.mxu1 %vm317_vm2, %v266_v42 }
 0x103   :  { %1031 = vmatmul.mubr.msk.f32.gmra.mxu1 %vm317_vm2, %v267_v43 }
 0x1b7   :  { %v1023_v47 = vpop.f32.mrf.mxu1 }
 0x1b8   :  { %v414_v5 = vadd.f32 %v1023_v47, %v285_v4  ;;  %v915_v47 = vld [vmem:[%s1395_s3 + $0x58] sm:$0xff] }
 0x1b9   :  { %v408_v48 = vpop.f32.mrf.mxu1 }
 0x1ba   :  { %v409_v9 = vadd.f32 %v408_v48, %v280_v8  ;;  %v456_v11 = vmul.f32 0.70710677, %v414_v5  ;;  %v448_v39 = vmul.f32 0.5, %v414_v5  ;;  %v916_v48 = vld [vmem:[%s1395_s3 + $0x60] sm:$0xff] }
 0x1bb   :  { %v1026_v50 = vpop.f32.mrf.mxu1 }
 0x1bc   :  { %v424_v61 = vadd.f32 %v1026_v50, %v295_v55  ;;  %v455_v12 = vmul.f32 0.70710677, %v409_v9  ;;  %v447_v42 = vmul.f32 0.5, %v409_v9  ;;  %v918_v50 = vld [vmem:[%s1395_s3 + $0x70] sm:$0xff] }
 0x1bd   :  { %v418_v52 = vpop.f32.mrf.mxu1 }
 0x1be   :  { %v419_v1 = vadd.f32 %v418_v52, %v290_v58  ;;  %v458_v6 = vmul.f32 0.70710677, %v424_v61  ;;  %v450_v32 = vmul.f32 0.5, %v424_v61  ;;  %v1141_v52 = vmov 0.0  }
 0x1bf   :  { %v1029_v53 = vpop.f32.mrf.mxu1  ;;  %1061 = vmatprep.subr.mxu1 %v1141_v52  ;;  %1077 = vmatprep.mubr.msk.f32.mxu1 %vm1142_vm3, %v1141_v52 }
 0x1c0   :  { %v434_v54 = vadd.f32 %v1029_v53, %v305_v49  ;;  %v457_v10 = vmul.f32 0.70710677, %v419_v1  ;;  %v449_v36 = vmul.f32 0.5, %v419_v1  ;;  %v917_v49 = vld [vmem:[%s1395_s3 + $0x68] sm:$0xff]  ;;  %v543_v53 = vpop.permute.xlu0 %542 }
 0x1c1   :  { %v428_v56 = vpop.f32.mrf.mxu1 }
 0x1c2   :  { %v429_v57 = vadd.f32 %v428_v56, %v300_v51  ;;  %v460_v59 = vmul.f32 0.70710677, %v434_v54  ;;  %v452_v24 = vmul.f32 0.5, %v434_v54  ;;  %v919_v51 = vld [vmem:[%s1395_s3 + $0x78] sm:$0xff]  ;;  %v538_v54 = vpop.permute.xlu1 %537 }
 0x1c3   :  { %v1032_v60 = vpop.f32.mrf.mxu1 }
 0x1c4   :  { %v444_v62 = vadd.f32 %v1032_v60, %v315_v45  ;;  %v459_v63 = vmul.f32 0.70710677, %v429_v57  ;;  %1106 = verf.f32 %v460_v59  ;;  %v451_v28 = vmul.f32 0.5, %v429_v57  ;;  %v913_v45 = vld [vmem:[%s1395_s3 + $0x48] sm:$0xff]  ;;  %v533_v57 = vpop.permute.xlu0 %532 }
 0x1c5   :  { %v438_v0 = vpop.f32.mrf.mxu1 }
 0x1c6   :  { %v462_v2 = vmul.f32 0.70710677, %v444_v62  ;;  %v439_v3 = vadd.f32 %v438_v0, %v310_v46  ;;  %v454_v16 = vmul.f32 0.5, %v444_v62  ;;  %v914_v46 = vld [vmem:[%s1395_s3 + $0x50] sm:$0xff]  ;;  %v528_v59 = vpop.permute.xlu1 %527 }
 0x1c8   :  { %1108 = verf.f32 %v462_v2  ;;  %v461_v7 = vmul.f32 0.70710677, %v439_v3  ;;  %v453_v19 = vmul.f32 0.5, %v439_v3 }
 0x1c9   :  { %1110 = verf.f32 %v459_v63  ;;  %v523_v63 = vpop.permute.xlu0 %522 }
 0x1ca   :  { %1112 = verf.f32 %v461_v7  ;;  %v518_v2 = vpop.permute.xlu1 %517 }
 0x1cb   :  { %1114 = verf.f32 %v458_v6 }
 0x1cc   :  { %1116 = verf.f32 %v457_v10 }
 0x1cd   :  { %1118 = verf.f32 %v456_v11 }
 0x1ce   :  { %1120 = verf.f32 %v455_v12  ;;  %v513_v12 = vpop.permute.xlu0 %512 }
 0x1d1   :  { %v1107_v13 = vpop.eup %1106 }
 0x1d2   :  { %v476_v22 = vadd.f32 1.0, %v1107_v13 }
 0x1d4   :  { %v484_v29 = vmul.f32 %v476_v22, %v452_v24 }
 0x1d5   :  { %v1109_v14 = vpop.eup %1108 }
 0x1d6   :  { %v1111_v15 = vpop.eup %1110  ;;  %v478_v17 = vadd.f32 1.0, %v1109_v14 }
 0x1d7   :  { %v1113_v18 = vpop.eup %1112  ;;  %v475_v26 = vadd.f32 1.0, %v1111_v15 }
 0x1d8   :  { %v486_v20 = vmul.f32 %v478_v17, %v454_v16  ;;  %v477_v21 = vadd.f32 1.0, %v1113_v18  ;;  %v1115_v23 = vpop.eup %1114  ;;  %v508_v16 = vpop.permute.xlu1 %507 }
 0x1d9   :  { %v1117_v27 = vpop.eup %1116  ;;  %v474_v30 = vadd.f32 1.0, %v1115_v23  ;;  %v483_v33 = vmul.f32 %v475_v26, %v451_v28 }
 0x1da   :  { %1033 = vmatprep.subr.mxu0 %v486_v20  ;;  %v485_v25 = vmul.f32 %v477_v21, %v453_v19  ;;  %v1119_v31 = vpop.eup %1118  ;;  %v473_v34 = vadd.f32 1.0, %v1117_v27 }
 0x1db   :  { %1034 = vmatpush3.msra.mxu0 %v486_v20  ;;  %v1121_v35 = vpop.eup %1120  ;;  %v482_v37 = vmul.f32 %v474_v30, %v450_v32  ;;  %v472_v38 = vadd.f32 1.0, %v1119_v31 }
 0x1dc   :  { %1035 = vmatprep.subr.mxu0 %v485_v25  ;;  %v481_v40 = vmul.f32 %v473_v34, %v449_v36  ;;  %v471_v41 = vadd.f32 1.0, %v1121_v35 }
 0x1dd   :  { %1036 = vmatpush3.msra.mxu0 %v485_v25  ;;  %v480_v43 = vmul.f32 %v472_v38, %v448_v39 }
 0x1de   :  { %1037 = vmatprep.subr.mxu0 %v484_v29  ;;  %v479_v44 = vmul.f32 %v471_v41, %v447_v42 }
 0x1df   :  { %1038 = vmatpush3.msra.mxu0 %v484_v29 }
 0x1e0   :  { %1039 = vmatprep.subr.mxu0 %v483_v33 }
 0x1e1   :  { %1040 = vmatpush3.msra.mxu0 %v483_v33 }
 0x1e2   :  { %1041 = vmatprep.subr.mxu0 %v482_v37 }
 0x1e3   :  { %1042 = vmatpush3.msra.mxu0 %v482_v37 }
 0x1e4   :  { %1043 = vmatprep.subr.mxu0 %v481_v40 }
 0x1e5   :  { %1044 = vmatpush3.msra.mxu0 %v481_v40 }
 0x1e6   :  { %1045 = vmatprep.subr.mxu0 %v480_v43 }
 0x1e7   :  { %1046 = vmatpush3.msra.mxu0 %v480_v43 }
 0x1e8   :  { %1047 = vmatprep.subr.mxu0 %v479_v44 }
 0x1e9   :  { %1048 = vmatpush3.msra.mxu0 %v479_v44 }
 0x1ea   :  { %1050 = vmatmul.mubr.msk.f32.vlgmr.msra.gmra.mxu0 %vm317_vm2, %v913_v45  ;;  %1080 = vmatprep.subr.mxu0 %v1141_v52 }
 0x1eb   :  { %1052 = vmatprep.mubr.msk.f32.mxu0 %vm317_vm2, %v914_v46 }
 0x1ee   :  { %1053 = vmatmul.mubr.msk.f32.gmra.mxu0 %vm317_vm2, %v915_v47 }
 0x1ef   :  { %1055 = vmatprep.mubr.msk.f32.mxu0 %vm317_vm2, %v916_v48 }
 0x1f2   :  { %1056 = vmatmul.mubr.msk.f32.gmra.mxu0 %vm317_vm2, %v917_v49 }
 0x1f3   :  { %1058 = vmatprep.mubr.msk.f32.mxu0 %vm317_vm2, %v918_v50 }
 0x1f6   :  { %1059 = vmatmul.mubr.msk.f32.gmra.mxu0 %vm317_vm2, %v919_v51 }
 0x1f7   :  { %1082 = vmatprep.mubr.msk.f32.mxu0 %vm1142_vm3, %v1141_v52 }
 0x2aa   :  { %v1051_v55 = vpop.f32.mrf.mxu0 }
 0x2ab   :  { %v641_v13 = vadd.f32 %v1051_v55, %v513_v12  ;;  %v719_v55 = vpop.permute.xlu0 %718 }
 0x2ac   :  { %v635_v56 = vpop.f32.mrf.mxu0 }
 0x2ad   :  { %v636_v17 = vadd.f32 %v635_v56, %v508_v16  ;;  %v683_v19 = vmul.f32 0.70710677, %v641_v13  ;;  %v675_v47 = vmul.f32 0.5, %v641_v13 }
 0x2ae   :  { %v1054_v58 = vpop.f32.mrf.mxu0 }
 0x2af   :  { %v651_v5 = vadd.f32 %v1054_v58, %v523_v63  ;;  %v682_v20 = vmul.f32 0.70710677, %v636_v17  ;;  %v674_v51 = vmul.f32 0.5, %v636_v17 }
 0x2b0   :  { %v645_v60 = vpop.f32.mrf.mxu0 }
 0x2b1   :  { %v646_v9 = vadd.f32 %v645_v60, %v518_v2  ;;  %v685_v14 = vmul.f32 0.70710677, %v651_v5  ;;  %v677_v40 = vmul.f32 0.5, %v651_v5 }
 0x2b2   :  { %v1057_v61 = vpop.f32.mrf.mxu0 }
 0x2b3   :  { %v661_v62 = vadd.f32 %v1057_v61, %v533_v57  ;;  %v684_v18 = vmul.f32 0.70710677, %v646_v9  ;;  %v676_v46 = vmul.f32 0.5, %v646_v9 }
 0x2b4   :  { %v655_v0 = vpop.f32.mrf.mxu0 }
 0x2b5   :  { %v656_v1 = vadd.f32 %v655_v0, %v528_v59  ;;  %v687_v3 = vmul.f32 0.70710677, %v661_v62  ;;  %v679_v32 = vmul.f32 0.5, %v661_v62  ;;  %v799_v0 = vld [vmem:[%s1397_s6] sm:$0x7] }
 0x2b6   :  { %v1060_v4 = vpop.f32.mrf.mxu0 }
 0x2b7   :  { %v671_v6 = vadd.f32 %v1060_v4, %v543_v53  ;;  %v686_v7 = vmul.f32 0.70710677, %v656_v1  ;;  %1122 = verf.f32 %v687_v3  ;;  %v678_v38 = vmul.f32 0.5, %v656_v1 }
 0x2b8   :  { %v665_v8 = vpop.f32.mrf.mxu0 }
 0x2b9   :  { %v689_v10 = vmul.f32 0.70710677, %v671_v6  ;;  %v666_v11 = vadd.f32 %v665_v8, %v538_v54  ;;  %v681_v24 = vmul.f32 0.5, %v671_v6  ;;  %v714_v54 = vld [vmem:[%s1396_s4] sm:$0x3f] }
 0x2bb   :  { %1124 = verf.f32 %v689_v10  ;;  %v688_v15 = vmul.f32 0.70710677, %v666_v11  ;;  %v680_v29 = vmul.f32 0.5, %v666_v11 }
 0x2bc   :  { %1126 = verf.f32 %v686_v7 }
 0x2bd   :  { %1128 = verf.f32 %v688_v15 }
 0x2be   :  { %1130 = verf.f32 %v685_v14 }
 0x2bf   :  { %1132 = verf.f32 %v684_v18 }
 0x2c0   :  { %1134 = verf.f32 %v683_v19 }
 0x2c1   :  { %1136 = verf.f32 %v682_v20 }
 0x2c4   :  { %v1123_v21 = vpop.eup %1122 }
 0x2c5   :  { %v703_v27 = vadd.f32 1.0, %v1123_v21 }
 0x2c7   :  { %v711_v37 = vmul.f32 %v703_v27, %v679_v32 }
 0x2c8   :  { %v1125_v22 = vpop.eup %1124 }
 0x2c9   :  { %v1127_v23 = vpop.eup %1126  ;;  %v705_v25 = vadd.f32 1.0, %v1125_v22 }
 0x2ca   :  { %v1129_v26 = vpop.eup %1128  ;;  %v702_v33 = vadd.f32 1.0, %v1127_v23 }
 0x2cb   :  { %v713_v28 = vmul.f32 %v705_v25, %v681_v24  ;;  %v704_v30 = vadd.f32 1.0, %v1129_v26  ;;  %v1131_v31 = vpop.eup %1130 }
 0x2cc   :  { %v1133_v35 = vpop.eup %1132  ;;  %v701_v36 = vadd.f32 1.0, %v1131_v31  ;;  %v710_v42 = vmul.f32 %v702_v33, %v678_v38 }
 0x2cd   :  { %v712_v34 = vmul.f32 %v704_v30, %v680_v29  ;;  %1062 = vmatpush3.msra.mxu1 %v713_v28  ;;  %v1135_v39 = vpop.eup %1134  ;;  %v700_v41 = vadd.f32 1.0, %v1133_v35 }
 0x2ce   :  { %1063 = vmatprep.subr.mxu1 %v1141_v52  ;;  %v1137_v43 = vpop.eup %1136  ;;  %v699_v44 = vadd.f32 1.0, %v1135_v39  ;;  %v709_v45 = vmul.f32 %v701_v36, %v677_v40 }
 0x2cf   :  { %1064 = vmatpush3.msra.mxu1 %v712_v34  ;;  %v698_v48 = vadd.f32 1.0, %v1137_v43  ;;  %v708_v49 = vmul.f32 %v700_v41, %v676_v46 }
 0x2d0   :  { %1065 = vmatprep.subr.mxu1 %v1141_v52  ;;  %v707_v50 = vmul.f32 %v699_v44, %v675_v47 }
 0x2d1   :  { %1066 = vmatpush3.msra.mxu1 %v711_v37  ;;  %v706_v53 = vmul.f32 %v698_v48, %v674_v51 }
 0x2d2   :  { %1067 = vmatprep.subr.mxu1 %v1141_v52 }
 0x2d3   :  { %1068 = vmatpush3.msra.mxu1 %v710_v42 }
 0x2d4   :  { %1069 = vmatprep.subr.mxu1 %v1141_v52 }
 0x2d5   :  { %1070 = vmatpush3.msra.mxu1 %v709_v45 }
 0x2d6   :  { %1071 = vmatprep.subr.mxu1 %v1141_v52 }
 0x2d7   :  { %1072 = vmatpush3.msra.mxu1 %v708_v49 }
 0x2d8   :  { %1073 = vmatprep.subr.mxu1 %v1141_v52 }
 0x2d9   :  { %1074 = vmatpush3.msra.mxu1 %v707_v50 }
 0x2da   :  { %1075 = vmatprep.subr.mxu1 %v1141_v52  ;;  %v804_v52 = vpop.permute.xlu1 %803 }
 0x2db   :  { %1076 = vmatpush3.msra.mxu1 %v706_v53 }
 0x2dc   :  { %1078 = vmatmul.mubr.msk.f32.vlgmr.msra.gmra.mxu1 %vm317_vm2, %v714_v54 }
 0x39c   :  { %v790_v56 = vpop.f32.mrf.mxu1 }
 0x39d   :  { %v791_v57 = vadd.f32 %v790_v56, %v719_v55 }
 0x39e   :  { %v1079_v58 = vpop.f32.mrf.mxu1 }
 0x39f   :  { %v795_v59 = vmul.f32 0.70710677, %v791_v57  ;;  %v794_v61 = vmul.f32 0.5, %v791_v57 }
 0x3a1   :  { %1138 = verf.f32 %v795_v59 }
 0x3ae   :  { %v1139_v60 = vpop.eup %1138 }
 0x3af   :  { %v797_v62 = vadd.f32 1.0, %v1139_v60 }
 0x3b1   :  { %v798_v63 = vmul.f32 %v797_v62, %v794_v61 }
 0x3b3   :  { %1081 = vmatpush3.msk.msra.mxu0 %vm111_vm0, %v798_v63 }
 0x3b4   :  { %1083 = vmatmul.mubr.msk.f32.vlgmr.msra.gmra.mxu0 %vm86_vm1, %v799_v0 }
 0x474   :  { %v878_v1 = vpop.f32.mrf.mxu0 }
 0x475   :  { %v879_v2 = vadd.f32 %v878_v1, %v804_v52 }
 0x476   :  { %v1084_v3 = vpop.f32.mrf.mxu0 }
 0x477   :  { %882 = vst [vmem:[%s1398_s8] sm:$0x7] %v879_v2 }

</bundles_post_ra>
